<compile_context>
chip_gen: v6e
topology: v6e:2x2x1
jax: 0.10.0
libtpu: 0.0.40
codegen_flags: <defaults>
</compile_context>

<pallas_src>
import functools

import jax
import jax.numpy as jnp
from jax.experimental import pallas as pl
from jax.experimental.pallas import tpu as pltpu

STRIDE = 4
KSIZE = 7
GROUPS = 2


# ----------------------------------------------------------------------------
# Fused kernel: pw1+BN1+tanh, *fd, pw2+BN2+PReLU, deconv+BN3+PReLU
# Layout inside the kernel: activations are (T, Cin*F); output is
# (T, Cout*F_out).  All matmuls are plain 2-D dots on lane-dense operands.
# ----------------------------------------------------------------------------
def fu_kernel(x_ref, fd_ref, w1x_ref, w1f_ref, b1_ref, w2_ref, b2_ref,
              wd_ref, b3_ref, o_ref, *, slope2, slope3):
    x = x_ref[0]      # (T, Cin*F)
    fd = fd_ref[0]    # (T, Cin*F)

    # pointwise_1 (split into x-part and fd-part to avoid an in-kernel concat)
    h1 = (jnp.dot(x, w1x_ref[...], preferred_element_type=jnp.float32)
          + jnp.dot(fd, w1f_ref[...], preferred_element_type=jnp.float32)
          + b1_ref[...])
    h1 = jnp.tanh(h1)
    h1 = h1 * fd

    # pointwise_2 + BN2 (scale folded) + PReLU
    h2 = jnp.dot(h1, w2_ref[...], preferred_element_type=jnp.float32) + b2_ref[...]
    h2 = jnp.where(h2 >= 0, h2, slope2 * h2)

    # grouped ConvTranspose2d as one dense scatter matmul (+ BN3 folded) + PReLU
    y = jnp.dot(h2, wd_ref[...], preferred_element_type=jnp.float32) + b3_ref[...]
    y = jnp.where(y >= 0, y, slope3 * y)

    o_ref[0] = y.astype(o_ref.dtype)


def fu_forward(x, fd, params):
    """x, fd: (B, Cin, T, F) NCHW. Returns (B, Cout, T, F_out) like PyTorch."""
    B, Cin, T, F = x.shape
    CF = Cin * F
    Cout = params['cout']
    Fout = params['fout']
    M = Cout * Fout

    # layout plumbing (outside the kernel): NCHW -> (B, T, Cin*F), lane-dense
    x_r = jnp.transpose(x, (0, 2, 1, 3)).reshape(B, T, CF)
    fd_r = jnp.transpose(fd, (0, 2, 1, 3)).reshape(B, T, CF)

    out = pl.pallas_call(
        functools.partial(fu_kernel, slope2=params['a2'], slope3=params['a3']),
        out_shape=jax.ShapeDtypeStruct((B, T, M), jnp.float32),
        grid=(B,),
        in_specs=[
            pl.BlockSpec((1, T, CF), lambda i: (i, 0, 0)),
            pl.BlockSpec((1, T, CF), lambda i: (i, 0, 0)),
            pl.BlockSpec((CF, CF), lambda i: (0, 0)),
            pl.BlockSpec((CF, CF), lambda i: (0, 0)),
            pl.BlockSpec((1, CF), lambda i: (0, 0)),
            pl.BlockSpec((CF, CF), lambda i: (0, 0)),
            pl.BlockSpec((1, CF), lambda i: (0, 0)),
            pl.BlockSpec((CF, M), lambda i: (0, 0)),
            pl.BlockSpec((1, M), lambda i: (0, 0)),
        ],
        out_specs=pl.BlockSpec((1, T, M), lambda i: (i, 0, 0)),
        compiler_params=pltpu.CompilerParams(
            dimension_semantics=("parallel",)),
    )(x_r, fd_r, params['w1x_d'], params['w1f_d'], params['b1'],
      params['w2_d'], params['b2'], params['wd'], params['b3'])

    # (B, T, Cout*Fout) -> (B, Cout, T, Fout)  (cheap wrapper-side plumbing)
    return jnp.transpose(out.reshape(B, T, Cout, Fout), (0, 2, 1, 3))


# ----------------------------------------------------------------------------
# Parameter init (raw PyTorch-style params) and one-time folding into the
# dense lane-dense matrices the kernel consumes.
# ----------------------------------------------------------------------------
def init_params(key, in_ch, out_ch, eps=1e-5):
    ks = iter(jax.random.split(key, 32))

    def nrm(shape, s=0.2):
        return s * jax.random.normal(next(ks), shape, dtype=jnp.float32)

    def bn(c):
        gamma = 1.0 + nrm((c,), 0.1)
        beta = nrm((c,), 0.1)
        mean = nrm((c,), 0.1)
        var = 1.0 + jnp.abs(nrm((c,), 0.1))
        scale = gamma / jnp.sqrt(var + eps)
        bias = beta - mean * scale
        return scale, bias

    raw = {}
    raw['w1'] = nrm((in_ch, 2 * in_ch))               # Conv2d(2Cin->Cin, 1x1), no bias
    raw['scale1'], raw['bias1'] = bn(in_ch)
    raw['w2'] = nrm((in_ch, in_ch))                   # Conv2d(Cin->Cin, 1x1), no bias
    raw['scale2'], raw['bias2'] = bn(in_ch)
    raw['wT'] = nrm((in_ch, out_ch // GROUPS, KSIZE))  # ConvTranspose2d weight
    raw['b_deconv'] = nrm((out_ch,), 0.05)
    raw['scale3'], raw['bias3'] = bn(out_ch)
    raw['a2'] = 0.25                                  # nn.PReLU() default
    raw['a3'] = 0.25
    return raw


def fold_params(raw, in_ch, out_ch, F):
    eyeF = jnp.eye(F, dtype=jnp.float32)

    # pointwise_1: split into x / fd halves, fold BN1 scale, lift to (C*F, C*F)
    s1 = raw['scale1']
    w1x = (raw['w1'][:, :in_ch] * s1[:, None]).T      # (c_in, c_out)
    w1f = (raw['w1'][:, in_ch:] * s1[:, None]).T
    w1x_d = jnp.kron(w1x, eyeF)
    w1f_d = jnp.kron(w1f, eyeF)
    b1 = jnp.repeat(raw['bias1'], F)[None, :]

    # pointwise_2 + BN2
    w2 = (raw['w2'] * raw['scale2'][:, None]).T
    w2_d = jnp.kron(w2, eyeF)
    b2 = jnp.repeat(raw['bias2'], F)[None, :]

    # grouped ConvTranspose2d (1,7)/(1,4) + BN3 -> dense (Cin*F, Cout*Fout)
    Fout = (F - 1) * STRIDE + KSIZE
    cpg = in_ch // GROUPS
    opg = out_ch // GROUPS
    wfull = jnp.zeros((in_ch, out_ch, KSIZE), jnp.float32)
    for g in range(GROUPS):
        wfull = wfull.at[g * cpg:(g + 1) * cpg,
                         g * opg:(g + 1) * opg, :].set(raw['wT'][g * cpg:(g + 1) * cpg])
    wfull = wfull * raw['scale3'][None, :, None]       # fold BN3 scale
    fi = jnp.arange(F)[:, None]
    fo = jnp.arange(Fout)[None, :]
    k = fo - STRIDE * fi
    valid = (k >= 0) & (k < KSIZE)
    kc = jnp.clip(k, 0, KSIZE - 1)
    wd4 = wfull[:, :, kc]                              # (Cin, Cout, F, Fout)
    wd4 = jnp.where(valid[None, None, :, :], wd4, 0.0)
    wd = jnp.transpose(wd4, (0, 2, 1, 3)).reshape(in_ch * F, out_ch * Fout)
    b3 = jnp.repeat(raw['scale3'] * raw['b_deconv'] + raw['bias3'], Fout)[None, :]

    return dict(w1x_d=w1x_d, w1f_d=w1f_d, b1=b1,
                w2_d=w2_d, b2=b2, wd=wd, b3=b3,
                cout=out_ch, fout=Fout, a2=raw['a2'], a3=raw['a3'])


# ----------------------------------------------------------------------------
# Plain-JAX reference (independent of the dense-matrix construction)
# ----------------------------------------------------------------------------
def _prelu(v, a):
    return jnp.where(v >= 0, v, a * v)


def fu_reference(x, fd, raw):
    B, Cin, T, F = x.shape
    cat = jnp.concatenate([x, fd], axis=1)
    h = jnp.einsum('oc,bctf->botf', raw['w1'], cat)
    h = h * raw['scale1'][None, :, None, None] + raw['bias1'][None, :, None, None]
    h = jnp.tanh(h) * fd
    h = jnp.einsum('oc,bctf->botf', raw['w2'], h)
    h = h * raw['scale2'][None, :, None, None] + raw['bias2'][None, :, None, None]
    h = _prelu(h, raw['a2'])

    Cout = raw['scale3'].shape[0]
    Fout = (F - 1) * STRIDE + KSIZE
    cpg, opg = Cin // GROUPS, Cout // GROUPS
    y = jnp.zeros((B, Cout, T, Fout), jnp.float32)
    for g in range(GROUPS):
        xg = h[:, g * cpg:(g + 1) * cpg]               # (B, cpg, T, F)
        wg = raw['wT'][g * cpg:(g + 1) * cpg]          # (cpg, opg, K)
        contrib = jnp.einsum('bctf,cok->botfk', xg, wg)
        for kk in range(KSIZE):
            y = y.at[:, g * opg:(g + 1) * opg, :,
                     kk:kk + STRIDE * F:STRIDE].add(contrib[..., kk])
    y = y + raw['b_deconv'][None, :, None, None]
    y = y * raw['scale3'][None, :, None, None] + raw['bias3'][None, :, None, None]
    return _prelu(y, raw['a3'])


if __name__ == "__main__":
    key = jax.random.PRNGKey(0)
    kx, kf, kp = jax.random.split(key, 3)

    B, Cin, Cout = 2, 4, 8
    T, F = 16, 32                       # Cin * F = 128 -> lane-dense activations

    x = jax.random.normal(kx, (B, Cin, T, F), dtype=jnp.float32)
    fd = jax.random.normal(kf, (B, Cin, T, F), dtype=jnp.float32)

    raw = init_params(kp, Cin, Cout)
    params = fold_params(raw, Cin, Cout, F)

    out = fu_forward(x, fd, params)
    jax.block_until_ready(out)

    Fout = (F - 1) * STRIDE + KSIZE
    assert out.shape == (B, Cout, T, Fout), out.shape
    assert bool(jnp.all(jnp.isfinite(out)))

    ref = fu_reference(x, fd, raw)
    err = float(jnp.max(jnp.abs(out - ref)))
    assert err < 1e-2, f"max abs diff vs reference: {err}"
    print("KERNEL_OK")
</pallas_src>

<mosaic_0001>
module attributes {stable_mosaic.version = 11 : i64} {
  func.func @fu_kernel(%arg0: i32, %arg1: memref<1x16x128xf32, #tpu.memory_space<vmem>>, %arg2: memref<1x16x128xf32, #tpu.memory_space<vmem>>, %arg3: memref<128x128xf32, #tpu.memory_space<vmem>>, %arg4: memref<128x128xf32, #tpu.memory_space<vmem>>, %arg5: memref<1x128xf32, #tpu.memory_space<vmem>>, %arg6: memref<128x128xf32, #tpu.memory_space<vmem>>, %arg7: memref<1x128xf32, #tpu.memory_space<vmem>>, %arg8: memref<128x1048xf32, #tpu.memory_space<vmem>>, %arg9: memref<1x1048xf32, #tpu.memory_space<vmem>>, %arg10: memref<1x16x1048xf32, #tpu.memory_space<vmem>>) attributes {dimension_semantics = [#tpu.dimension_semantics<parallel>], iteration_bounds = array<i64: 2>, scalar_prefetch = 0 : i64, scratch_operands = 0 : i64, tpu.core_type = #tpu.core_type<tc>, window_params = [{transform_indices = @transform_0, window_bounds = array<i64: 1, 16, 128>}, {transform_indices = @transform_1, window_bounds = array<i64: 1, 16, 128>}, {pipeline_mode = #tpu.pipeline_mode<synchronous>, transform_indices = @transform_2, window_bounds = array<i64: 128, 128>}, {pipeline_mode = #tpu.pipeline_mode<synchronous>, transform_indices = @transform_3, window_bounds = array<i64: 128, 128>}, {pipeline_mode = #tpu.pipeline_mode<synchronous>, transform_indices = @transform_4, window_bounds = array<i64: 1, 128>}, {pipeline_mode = #tpu.pipeline_mode<synchronous>, transform_indices = @transform_5, window_bounds = array<i64: 128, 128>}, {pipeline_mode = #tpu.pipeline_mode<synchronous>, transform_indices = @transform_6, window_bounds = array<i64: 1, 128>}, {pipeline_mode = #tpu.pipeline_mode<synchronous>, transform_indices = @transform_7, window_bounds = array<i64: 128, 1048>}, {pipeline_mode = #tpu.pipeline_mode<synchronous>, transform_indices = @transform_8, window_bounds = array<i64: 1, 1048>}, {transform_indices = @transform_9, window_bounds = array<i64: 1, 16, 1048>}]} {
    %c0 = arith.constant 0 : index
    %c0_0 = arith.constant 0 : index
    %c0_1 = arith.constant 0 : index
    %0 = vector.load %arg1[%c0, %c0_0, %c0_1] : memref<1x16x128xf32, #tpu.memory_space<vmem>>, vector<1x16x128xf32>
    %1 = vector.shape_cast %0 : vector<1x16x128xf32> to vector<16x128xf32>
    %c0_2 = arith.constant 0 : index
    %c0_3 = arith.constant 0 : index
    %c0_4 = arith.constant 0 : index
    %2 = vector.load %arg2[%c0_2, %c0_3, %c0_4] : memref<1x16x128xf32, #tpu.memory_space<vmem>>, vector<1x16x128xf32>
    %3 = vector.shape_cast %2 : vector<1x16x128xf32> to vector<16x128xf32>
    %c0_5 = arith.constant 0 : index
    %c0_6 = arith.constant 0 : index
    %4 = vector.load %arg3[%c0_5, %c0_6] : memref<128x128xf32, #tpu.memory_space<vmem>>, vector<128x128xf32>
    %cst = arith.constant dense<0.000000e+00> : vector<16x128xf32>
    %5 = tpu.matmul %1, %4, %cst {dimension_numbers = #tpu.dot_dimension_numbers<[1], [0], [0], [1], [0, 0, 1, 1], [], []>} : vector<16x128xf32>, vector<128x128xf32>, vector<16x128xf32> -> vector<16x128xf32>
    %c0_7 = arith.constant 0 : index
    %c0_8 = arith.constant 0 : index
    %6 = vector.load %arg4[%c0_7, %c0_8] : memref<128x128xf32, #tpu.memory_space<vmem>>, vector<128x128xf32>
    %cst_9 = arith.constant dense<0.000000e+00> : vector<16x128xf32>
    %7 = tpu.matmul %3, %6, %cst_9 {dimension_numbers = #tpu.dot_dimension_numbers<[1], [0], [0], [1], [0, 0, 1, 1], [], []>} : vector<16x128xf32>, vector<128x128xf32>, vector<16x128xf32> -> vector<16x128xf32>
    %8 = arith.addf %5, %7 : vector<16x128xf32>
    %c0_10 = arith.constant 0 : index
    %c0_11 = arith.constant 0 : index
    %9 = vector.load %arg5[%c0_10, %c0_11] : memref<1x128xf32, #tpu.memory_space<vmem>>, vector<1x128xf32>
    %10 = vector.broadcast %9 : vector<1x128xf32> to vector<16x128xf32>
    %11 = arith.addf %8, %10 : vector<16x128xf32>
    %12 = math.tanh %11 : vector<16x128xf32>
    %13 = arith.mulf %12, %3 : vector<16x128xf32>
    %c0_12 = arith.constant 0 : index
    %c0_13 = arith.constant 0 : index
    %14 = vector.load %arg6[%c0_12, %c0_13] : memref<128x128xf32, #tpu.memory_space<vmem>>, vector<128x128xf32>
    %cst_14 = arith.constant dense<0.000000e+00> : vector<16x128xf32>
    %15 = tpu.matmul %13, %14, %cst_14 {dimension_numbers = #tpu.dot_dimension_numbers<[1], [0], [0], [1], [0, 0, 1, 1], [], []>} : vector<16x128xf32>, vector<128x128xf32>, vector<16x128xf32> -> vector<16x128xf32>
    %c0_15 = arith.constant 0 : index
    %c0_16 = arith.constant 0 : index
    %16 = vector.load %arg7[%c0_15, %c0_16] : memref<1x128xf32, #tpu.memory_space<vmem>>, vector<1x128xf32>
    %17 = vector.broadcast %16 : vector<1x128xf32> to vector<16x128xf32>
    %18 = arith.addf %15, %17 : vector<16x128xf32>
    %cst_17 = arith.constant 0.000000e+00 : f32
    %19 = vector.broadcast %cst_17 : f32 to vector<16x128xf32>
    %20 = arith.cmpf oge, %18, %19 : vector<16x128xf32>
    %cst_18 = arith.constant 2.500000e-01 : f32
    %21 = vector.broadcast %cst_18 : f32 to vector<16x128xf32>
    %22 = arith.mulf %21, %18 : vector<16x128xf32>
    %23 = arith.select %20, %18, %22 : vector<16x128xi1>, vector<16x128xf32>
    %c0_19 = arith.constant 0 : index
    %c0_20 = arith.constant 0 : index
    %24 = vector.load %arg8[%c0_19, %c0_20] : memref<128x1048xf32, #tpu.memory_space<vmem>>, vector<128x1048xf32>
    %cst_21 = arith.constant dense<0.000000e+00> : vector<16x1048xf32>
    %25 = tpu.matmul %23, %24, %cst_21 {dimension_numbers = #tpu.dot_dimension_numbers<[1], [0], [0], [1], [0, 0, 1, 1], [], []>} : vector<16x128xf32>, vector<128x1048xf32>, vector<16x1048xf32> -> vector<16x1048xf32>
    %c0_22 = arith.constant 0 : index
    %c0_23 = arith.constant 0 : index
    %26 = vector.load %arg9[%c0_22, %c0_23] : memref<1x1048xf32, #tpu.memory_space<vmem>>, vector<1x1048xf32>
    %27 = vector.broadcast %26 : vector<1x1048xf32> to vector<16x1048xf32>
    %28 = arith.addf %25, %27 : vector<16x1048xf32>
    %cst_24 = arith.constant 0.000000e+00 : f32
    %29 = vector.broadcast %cst_24 : f32 to vector<16x1048xf32>
    %30 = arith.cmpf oge, %28, %29 : vector<16x1048xf32>
    %cst_25 = arith.constant 2.500000e-01 : f32
    %31 = vector.broadcast %cst_25 : f32 to vector<16x1048xf32>
    %32 = arith.mulf %31, %28 : vector<16x1048xf32>
    %33 = arith.select %30, %28, %32 : vector<16x1048xi1>, vector<16x1048xf32>
    %c0_26 = arith.constant 0 : index
    %c0_27 = arith.constant 0 : index
    %c0_28 = arith.constant 0 : index
    %34 = vector.load %arg10[%c0_26, %c0_27, %c0_28] : memref<1x16x1048xf32, #tpu.memory_space<vmem>>, vector<1x16x1048xf32>
    %35 = vector.shape_cast %34 : vector<1x16x1048xf32> to vector<16x1048xf32>
    %36 = vector.shape_cast %33 : vector<16x1048xf32> to vector<1x16x1048xf32>
    tpu.vector_store %arg10[%c0_26, %c0_27, %c0_28], %36 {strides = array<i32>} : memref<1x16x1048xf32, #tpu.memory_space<vmem>>, vector<1x16x1048xf32>,
    return
  }
  func.func @transform_0(%arg0: i32) -> (i32, i32, i32) {
    %c0_i32 = arith.constant 0 : i32
    %c0_i32_0 = arith.constant 0 : i32
    %c0_i32_1 = arith.constant 0 : i32
    return %arg0, %c0_i32, %c0_i32_0 : i32, i32, i32
  }
  func.func @transform_1(%arg0: i32) -> (i32, i32, i32) {
    %c0_i32 = arith.constant 0 : i32
    %c0_i32_0 = arith.constant 0 : i32
    %c0_i32_1 = arith.constant 0 : i32
    return %arg0, %c0_i32, %c0_i32_0 : i32, i32, i32
  }
  func.func @transform_2(%arg0: i32) -> (i32, i32) {
    %c0_i32 = arith.constant 0 : i32
    %c0_i32_0 = arith.constant 0 : i32
    %c0_i32_1 = arith.constant 0 : i32
    return %c0_i32, %c0_i32_0 : i32, i32
  }
  func.func @transform_3(%arg0: i32) -> (i32, i32) {
    %c0_i32 = arith.constant 0 : i32
    %c0_i32_0 = arith.constant 0 : i32
    %c0_i32_1 = arith.constant 0 : i32
    return %c0_i32, %c0_i32_0 : i32, i32
  }
  func.func @transform_4(%arg0: i32) -> (i32, i32) {
    %c0_i32 = arith.constant 0 : i32
    %c0_i32_0 = arith.constant 0 : i32
    %c0_i32_1 = arith.constant 0 : i32
    return %c0_i32, %c0_i32_0 : i32, i32
  }
  func.func @transform_5(%arg0: i32) -> (i32, i32) {
    %c0_i32 = arith.constant 0 : i32
    %c0_i32_0 = arith.constant 0 : i32
    %c0_i32_1 = arith.constant 0 : i32
    return %c0_i32, %c0_i32_0 : i32, i32
  }
  func.func @transform_6(%arg0: i32) -> (i32, i32) {
    %c0_i32 = arith.constant 0 : i32
    %c0_i32_0 = arith.constant 0 : i32
    %c0_i32_1 = arith.constant 0 : i32
    return %c0_i32, %c0_i32_0 : i32, i32
  }
  func.func @transform_7(%arg0: i32) -> (i32, i32) {
    %c0_i32 = arith.constant 0 : i32
    %c0_i32_0 = arith.constant 0 : i32
    %c0_i32_1 = arith.constant 0 : i32
    return %c0_i32, %c0_i32_0 : i32, i32
  }
  func.func @transform_8(%arg0: i32) -> (i32, i32) {
    %c0_i32 = arith.constant 0 : i32
    %c0_i32_0 = arith.constant 0 : i32
    %c0_i32_1 = arith.constant 0 : i32
    return %c0_i32, %c0_i32_0 : i32, i32
  }
  func.func @transform_9(%arg0: i32) -> (i32, i32, i32) {
    %c0_i32 = arith.constant 0 : i32
    %c0_i32_0 = arith.constant 0 : i32
    %c0_i32_1 = arith.constant 0 : i32
    return %arg0, %c0_i32, %c0_i32_0 : i32, i32, i32
  }
}

</mosaic_0001>

<bundles_post_ra>
// kernel: tpu_custom_call.1
= control target key start
LH: loop header
LB: loop body
LE: loop exit
PB: predicated region body
PF: predicated region fallthrough
CT: control target
= control target key end

     0   :  { %14 = vsyncpa [#allocation3], 0  ;;  %s2551_s0 = inlined_call_operand.vmem [shape: f32[2,16,128], index: 0, kind: input, shape index: {}]   ;;  %s2552_s1 = inlined_call_operand.vmem [shape: f32[2,16,128], index: 1, kind: input, shape index: {}]   ;;  %s2553_s2 = inlined_call_operand.vmem [shape: f32[128,128], index: 2, kind: input, shape index: {}]   ;;  %s2554_s3 = inlined_call_operand.vmem [shape: f32[128,128], index: 3, kind: input, shape index: {}]   ;;  %s2555_s4 = inlined_call_operand.vmem [shape: f32[1,128], index: 4, kind: input, shape index: {}]   ;;  %s2556_s5 = inlined_call_operand.vmem [shape: f32[128,128], index: 5, kind: input, shape index: {}]   ;;  %s2557_s6 = inlined_call_operand.vmem [shape: f32[1,128], index: 6, kind: input, shape index: {}]   ;;  %s2558_s7 = inlined_call_operand.vmem [shape: f32[128,1048], index: 7, kind: input, shape index: {}]   ;;  %s2559_s8 = inlined_call_operand.vmem [shape: f32[1,1048], index: 8, kind: input, shape index: {}]   ;;  %s2560_s9 = inlined_call_operand.hbm [shape: f32[2,16,1048], index: 9, kind: output, shape index: {}]  }
   0x1   :  { %16 = vsyncpa [#allocation3 + $0x1], 0  ;;  %s1783_s30 = smov 0   ;;  %s1785_s10 = smov 0  }
   0x2   :  { %s1787_s11 = smov 0   ;;  %s1789_s12 = smov 0  }
   0x3 LB: > { %s1804_s13 = sadd.s32 4294967295, %s1727_s12   ;;  %s1391_s14 = sadd.s32 4294967294, %s1727_s12   ;;  %s1727_s12 = sphi %s1789_s12, %s2568_s12   ;;  %s1723_s11 = sphi %s1787_s11, %s2567_s11   ;;  %s1719_s10 = sphi %s1785_s10, %s2566_s10   ;;  %s1715_s30 = sphi %s1783_s30, %s2565_s30  }
   0x4   : > { %s1808_s15 = sadd.s32 1, %s1727_s12   ;;  %s228_s16 = sadd.s32 1, %s1723_s11 }
   0x5   : > { %s225_s17 = ssub.s32 %s1727_s12, %s1808_s15  ;;  %p238_p0 = scmp.ne.s32.totalorder %s1723_s11, %s1719_s10 }
   0x6   : > { %p226_p1 = scmp.eq.s32.totalorder %s225_s17, 0  ;;  %p239_p2 = scmp.eq.s32.totalorder %s1804_s13, 1 }
   0x7   : > { %p244_p3 = scmp.ne.s32.totalorder %s1719_s10, %s1715_s30  ;;  %p245_p4 = scmp.eq.s32.totalorder %s1391_s14, 1 }
   0x8   : > { %s1819_s18 = scalar_select %p226_p1, %s1723_s11, %s228_s16  }
   0x9   : > { %p1821_p5 = por %p239_p2, %p238_p0  ;;  %p1825_p6 = por %p245_p4, %p244_p3 }
   0xa   : > { %2561 = sst [smem:[#allocation5_spill]] %s1819_s18  ;;  %p1394_p7 = scmp.ge.s32.totalorder %s1727_s12, 1 }
   0xb   : > { %p300_p8 = scmp.lt.s32.totalorder %s1727_s12, 3 }
   0xd   : > { %p301_p9 = pnand %p1394_p7, %p300_p8 }
   0xe   : > { %p341_p10 = scmp.lt.s32.totalorder (!%p301_p9), %s1804_s13, 1  ;;  %s1730_s21 = smov (!%p301_p9), [#allocation2]  }
   0xf   : > { %304 = sbr.rel (%p301_p9) target bundleno = 753 (0x2f1), region = 56  ;;  %s1671_s18 = sshll.u32 (!%p301_p9), %s1730_s21, 4  ;;  %s1672_s18 = int_to_ptr.vmem [resolvable:$false] %s1671_s18 }
  0x14   : > { %v386_v0 = vld [vmem:[%s2554_s3 + $0x78] sm:$0xff]  ;;  %v385_v2 = vld [vmem:[%s2554_s3 + $0x70] sm:$0xff]  ;;  %v384_v4 = vld [vmem:[%s2554_s3 + $0x68] sm:$0xff]  ;;  %s342_s29 = scalar_select %p341_p10, %s1804_s13, 1 }
  0x15   : > { %v370_v1 = vld [vmem:[%s2553_s2 + $0x78] sm:$0xff]  ;;  %1479 = vmatprep.subr.mxu0 %v386_v0  ;;  %v369_v3 = vld [vmem:[%s2553_s2 + $0x70] sm:$0xff]  ;;  %v368_v5 = vld [vmem:[%s2553_s2 + $0x68] sm:$0xff] }
  0x16   : > { %1514 = vmatprep.subr.mxu1 %v370_v1  ;;  %1480 = vmatpush3.msra.mxu0 %v386_v0  ;;  %v383_v6 = vld [vmem:[%s2554_s3 + $0x60] sm:$0xff]  ;;  %v382_v8 = vld [vmem:[%s2554_s3 + $0x58] sm:$0xff]  ;;  %v381_v10 = vld [vmem:[%s2554_s3 + $0x50] sm:$0xff]  ;;  %s1405_s26 = sshll.u32 %s342_s29, 4 }
  0x17   : > { %1515 = vmatpush3.msra.mxu1 %v370_v1  ;;  %1481 = vmatprep.subr.mxu0 %v385_v2  ;;  %v367_v7 = vld [vmem:[%s2553_s2 + $0x60] sm:$0xff]  ;;  %v366_v9 = vld [vmem:[%s2553_s2 + $0x58] sm:$0xff]  ;;  %v365_v11 = vld [vmem:[%s2553_s2 + $0x50] sm:$0xff]  ;;  %s350_s25 = scalar_lea.vmem %s2552_s1, %s1405_s26  ;;  %s345_s14 = scalar_lea.vmem %s2551_s0, %s1405_s26 }
  0x18   : > { %1516 = vmatprep.subr.mxu1 %v369_v3  ;;  %1482 = vmatpush3.msra.mxu0 %v385_v2  ;;  %v380_v12 = vld [vmem:[%s2554_s3 + $0x48] sm:$0xff]  ;;  %v379_v14 = vld [vmem:[%s2554_s3 + $0x40] sm:$0xff]  ;;  %v378_v16 = vld [vmem:[%s2554_s3 + $0x38] sm:$0xff]  ;;  %s338_s26 = sand.u32 1, %s1719_s10  }
  0x19   : > { %1517 = vmatpush3.msra.mxu1 %v369_v3  ;;  %1483 = vmatprep.subr.mxu0 %v384_v4  ;;  %v364_v13 = vld [vmem:[%s2553_s2 + $0x48] sm:$0xff]  ;;  %v363_v15 = vld [vmem:[%s2553_s2 + $0x40] sm:$0xff]  ;;  %v362_v17 = vld [vmem:[%s2553_s2 + $0x38] sm:$0xff]  ;;  %s1619_s22 = smul.u32 144, %s338_s26 }
  0x1a   : > { %1518 = vmatprep.subr.mxu1 %v368_v5  ;;  %1484 = vmatpush3.msra.mxu0 %v384_v4  ;;  %v377_v18 = vld [vmem:[%s2554_s3 + $0x30] sm:$0xff]  ;;  %v376_v20 = vld [vmem:[%s2554_s3 + $0x28] sm:$0xff]  ;;  %v375_v22 = vld [vmem:[%s2554_s3 + $0x20] sm:$0xff] }
  0x1b   : > { %1519 = vmatpush3.msra.mxu1 %v368_v5  ;;  %1485 = vmatprep.subr.mxu0 %v383_v6  ;;  %v361_v19 = vld [vmem:[%s2553_s2 + $0x30] sm:$0xff]  ;;  %v360_v21 = vld [vmem:[%s2553_s2 + $0x28] sm:$0xff]  ;;  %v359_v23 = vld [vmem:[%s2553_s2 + $0x20] sm:$0xff]  ;;  %s2469_s29 = scalar_lea.vmem [#allocation2], %s1619_s22  ;;  %s1673_s22 = scalar_lea.vmem %s1672_s18, 4608 }
  0x1c   : > { %1520 = vmatprep.subr.mxu1 %v367_v7  ;;  %1486 = vmatpush3.msra.mxu0 %v383_v6  ;;  %v374_v24 = vld [vmem:[%s2554_s3 + $0x18] sm:$0xff]  ;;  %v373_v26 = vld [vmem:[%s2554_s3 + $0x10] sm:$0xff]  ;;  %v372_v28 = vld [vmem:[%s2554_s3 + $0x8] sm:$0xff]  ;;  %s1317_s27 = sshll.u32 %s2469_s29, 4  ;;  %s2506_s27 = int_to_ptr.vmem [resolvable:$true] %s1317_s27 }
  0x1d   : > { %1521 = vmatpush3.msra.mxu1 %v367_v7  ;;  %1487 = vmatprep.subr.mxu0 %v382_v8  ;;  %v358_v25 = vld [vmem:[%s2553_s2 + $0x18] sm:$0xff]  ;;  %v357_v27 = vld [vmem:[%s2553_s2 + $0x10] sm:$0xff]  ;;  %v356_v29 = vld [vmem:[%s2553_s2 + $0x8] sm:$0xff]  ;;  %s1667_s17 = scalar_lea.vmem %s2506_s27, 2304  ;;  %p1674_p0 = scmp.lt.s32.totalorder %s2506_s27, %s1672_s18 }
  0x1e   : > { %1522 = vmatprep.subr.mxu1 %v366_v9  ;;  %1488 = vmatpush3.msra.mxu0 %v382_v8  ;;  %v371_v30 = vld [vmem:[%s2554_s3] sm:$0xff]  ;;  %v1937_v34 = vld [vmem:[%s350_s25 + $0x8] sm:$0xff]  ;;  %v565_v36 = vld [vmem:[%s2556_s5 + $0x78] sm:$0xff]  ;;  %p1668_p11 = scmp.ne.s32.totalorder %s2506_s27, %s1667_s17  ;;  %p1675_p1 = scmp.lt.s32.totalorder %s1673_s22, %s1667_s17 }
  0x1f   : > { %1523 = vmatpush3.msra.mxu1 %v366_v9  ;;  %1489 = vmatprep.subr.mxu0 %v381_v10  ;;  %v355_v31 = vld [vmem:[%s2553_s2] sm:$0xff]  ;;  %v352_v35 = vld [vmem:[%s345_s14 + $0x8] sm:$0xff]  ;;  %v564_v37 = vld [vmem:[%s2556_s5 + $0x70] sm:$0xff] }
  0x20   : > { %1524 = vmatprep.subr.mxu1 %v365_v11  ;;  %1490 = vmatpush3.msra.mxu0 %v381_v10  ;;  %v1935_v32 = vld [vmem:[%s350_s25] sm:$0xff]  ;;  %v563_v38 = vld [vmem:[%s2556_s5 + $0x68] sm:$0xff]  ;;  %v561_v40 = vld [vmem:[%s2556_s5 + $0x58] sm:$0xff]  ;;  %s1620_s25 = smul.u32 2304, %s1804_s13  ;;  %s2511_s13 = scalar_lea.sflag [#allocation3], %s338_s26 }
  0x21   : > { %1525 = vmatpush3.msra.mxu1 %v365_v11  ;;  %1491 = vmatprep.subr.mxu0 %v380_v12  ;;  %v351_v33 = vld [vmem:[%s345_s14] sm:$0xff]  ;;  %v560_v41 = vld [vmem:[%s2556_s5 + $0x50] sm:$0xff]  ;;  %v559_v42 = vld [vmem:[%s2556_s5 + $0x48] sm:$0xff]  ;;  %p1669_p12 = pnand %p1668_p11, %p1821_p5  ;;  %p1676_p2 = por %p1675_p1, %p1674_p0 }
  0x22   : > { %1526 = vmatprep.subr.mxu1 %v364_v13  ;;  %1492 = vmatpush3.msra.mxu0 %v380_v12  ;;  %v562_v39 = vld [vmem:[%s2556_s5 + $0x60] sm:$0xff]  ;;  %v557_v44 = vld [vmem:[%s2556_s5 + $0x38] sm:$0xff]  ;;  %v556_v45 = vld [vmem:[%s2556_s5 + $0x30] sm:$0xff]  ;;  %s2503_s16 = scalar_lea.hbm %s2560_s9, %s1620_s25 }
  0x23   : > { %1527 = vmatpush3.msra.mxu1 %v364_v13  ;;  %1493 = vmatprep.subr.mxu0 %v379_v14  ;;  %v558_v43 = vld [vmem:[%s2556_s5 + $0x40] sm:$0xff]  ;;  %v555_v46 = vld [vmem:[%s2556_s5 + $0x28] sm:$0xff]  ;;  %v553_v48 = vld [vmem:[%s2556_s5 + $0x18] sm:$0xff]  ;;  %p1670_p13 = pneg %p1669_p12 }
  0x24   : > { %1528 = vmatprep.subr.mxu1 %v363_v15  ;;  %1494 = vmatpush3.msra.mxu0 %v379_v14  ;;  %v554_v47 = vld [vmem:[%s2556_s5 + $0x20] sm:$0xff]  ;;  %v552_v49 = vld [vmem:[%s2556_s5 + $0x10] sm:$0xff]  ;;  %v551_v50 = vld [vmem:[%s2556_s5 + $0x8] sm:$0xff] }
  0x25   : > { %1529 = vmatpush3.msra.mxu1 %v363_v15  ;;  %1495 = vmatprep.subr.mxu0 %v378_v16  ;;  %v550_v51 = vld [vmem:[%s2556_s5] sm:$0xff]  ;;  %v792_v53 = vld [vmem:[%s2558_s7 + $0x450] sm:$0xff]  ;;  %v789_v54 = vld [vmem:[%s2558_s7 + $0x438] sm:$0xff]  ;;  %p1677_p3 = pnand %p1676_p2, %p1670_p13 }
  0x26   : > { %1530 = vmatprep.subr.mxu1 %v362_v17  ;;  %1496 = vmatpush3.msra.mxu0 %v378_v16  ;;  %v790_v52 = vld [vmem:[%s2558_s7 + $0x440] sm:$0xff]  ;;  %v781_v55 = vld [vmem:[%s2558_s7 + $0x3f8] sm:$0xff]  ;;  %v780_v56 = vld [vmem:[%s2558_s7 + $0x3f0] sm:$0xff] }
  0x27   : > { %1531 = vmatpush3.msra.mxu1 %v362_v17  ;;  %1497 = vmatprep.subr.mxu0 %v377_v18  ;;  %v772_v57 = vld [vmem:[%s2558_s7 + $0x3b0] sm:$0xff]  ;;  %v771_v58 = vld [vmem:[%s2558_s7 + $0x3a8] sm:$0xff]  ;;  %v762_v60 = vld [vmem:[%s2558_s7 + $0x360] sm:$0xff] }
  0x28   : > { %1532 = vmatprep.subr.mxu1 %v361_v19  ;;  %1498 = vmatpush3.msra.mxu0 %v377_v18  ;;  %v763_v59 = vld [vmem:[%s2558_s7 + $0x368] sm:$0xff]  ;;  %v754_v61 = vld [vmem:[%s2558_s7 + $0x320] sm:$0xff]  ;;  %v753_v62 = vld [vmem:[%s2558_s7 + $0x318] sm:$0xff] }
  0x29   : > { %1533 = vmatpush3.msra.mxu1 %v361_v19  ;;  %1499 = vmatprep.subr.mxu0 %v376_v20  ;;  %v745_v63 = vld [vmem:[%s2558_s7 + $0x2d8] sm:$0xff]  ;;  %v744_v0 = vld [vmem:[%s2558_s7 + $0x2d0] sm:$0xff]  ;;  %v735_v2 = vld [vmem:[%s2558_s7 + $0x288] sm:$0xff] }
  0x2a   : > { %1534 = vmatprep.subr.mxu1 %v360_v21  ;;  %1500 = vmatpush3.msra.mxu0 %v376_v20  ;;  %v736_v1 = vld [vmem:[%s2558_s7 + $0x290] sm:$0xff]  ;;  %v727_v3 = vld [vmem:[%s2558_s7 + $0x248] sm:$0xff]  ;;  %v726_v4 = vld [vmem:[%s2558_s7 + $0x240] sm:$0xff] }
  0x2b   : > { %1535 = vmatpush3.msra.mxu1 %v360_v21  ;;  %1501 = vmatprep.subr.mxu0 %v375_v22  ;;  %v718_v5 = vld [vmem:[%s2558_s7 + $0x200] sm:$0xff]  ;;  %v717_v6 = vld [vmem:[%s2558_s7 + $0x1f8] sm:$0xff]  ;;  %v708_v8 = vld [vmem:[%s2558_s7 + $0x1b0] sm:$0xff] }
  0x2c   : > { %1536 = vmatprep.subr.mxu1 %v359_v23  ;;  %1502 = vmatpush3.msra.mxu0 %v375_v22  ;;  %v709_v7 = vld [vmem:[%s2558_s7 + $0x1b8] sm:$0xff]  ;;  %v700_v9 = vld [vmem:[%s2558_s7 + $0x170] sm:$0xff]  ;;  %v699_v10 = vld [vmem:[%s2558_s7 + $0x168] sm:$0xff] }
  0x2d   : > { %1537 = vmatpush3.msra.mxu1 %v359_v23  ;;  %1503 = vmatprep.subr.mxu0 %v374_v24  ;;  %v691_v11 = vld [vmem:[%s2558_s7 + $0x128] sm:$0xff]  ;;  %v690_v12 = vld [vmem:[%s2558_s7 + $0x120] sm:$0xff] }
  0x2e   : > { %1538 = vmatprep.subr.mxu1 %v358_v25  ;;  %1504 = vmatpush3.msra.mxu0 %v374_v24  ;;  %v682_v13 = vld [vmem:[%s2558_s7 + $0xe0] sm:$0xff] }
  0x2f   : > { %1539 = vmatpush3.msra.mxu1 %v358_v25  ;;  %1505 = vmatprep.subr.mxu0 %v373_v26  ;;  %v1399_v16 = vld [vmem:[%s2555_s4] ss:$0 sm:$0xff] }
  0x30   : > { %1540 = vmatprep.subr.mxu1 %v357_v27  ;;  %1506 = vmatpush3.msra.mxu0 %v373_v26 }
  0x31   : > { %1541 = vmatpush3.msra.mxu1 %v357_v27  ;;  %1507 = vmatprep.subr.mxu0 %v372_v28  ;;  %v791_v27 = vld [vmem:[%s2558_s7 + $0x448] sm:$0xff] }
  0x32   : > { %1542 = vmatprep.subr.mxu1 %v356_v29  ;;  %1508 = vmatpush3.msra.mxu0 %v372_v28  ;;  %v783_v28 = vld [vmem:[%s2558_s7 + $0x408] sm:$0xff] }
  0x33   : > { %1543 = vmatpush3.msra.mxu1 %v356_v29  ;;  %1509 = vmatprep.subr.mxu0 %v371_v30  ;;  %v782_v29 = vld [vmem:[%s2558_s7 + $0x400] sm:$0xff] }
  0x34   : > { %1544 = vmatprep.subr.mxu1 %v355_v31  ;;  %1510 = vmatpush3.msra.mxu0 %v371_v30  ;;  %v774_v30 = vld [vmem:[%s2558_s7 + $0x3c0] sm:$0xff] }
  0x35   : > { %1511 = vmatprep.mubr.f32.mxu0 %v1935_v32  ;;  %1545 = vmatpush3.msra.mxu1 %v355_v31  ;;  %v773_v31 = vld [vmem:[%s2558_s7 + $0x3b8] sm:$0xff] }
  0x36   : > { %1546 = vmatprep.mubr.f32.mxu1 %v351_v33  ;;  %1512 = vmatmul.mubr.f32.vlgmr.msra.gmra.mxu0 %v1937_v34  ;;  %v764_v33 = vld [vmem:[%s2558_s7 + $0x370] sm:$0xff] }
  0x37   : > { %1547 = vmatmul.mubr.f32.vlgmr.msra.gmra.mxu1 %v352_v35  ;;  %1549 = vmatprep.subr.mxu0 %v565_v36  ;;  %v755_v35 = vld [vmem:[%s2558_s7 + $0x328] sm:$0xff] }
  0x38   : > { %1550 = vmatpush3.msra.mxu0 %v565_v36  ;;  %847 = vmatprep.subr.mxu1 %v790_v52  ;;  %v747_v36 = vld [vmem:[%s2558_s7 + $0x2e8] sm:$0xff] }
  0x39   : > { %1551 = vmatprep.subr.mxu0 %v564_v37  ;;  %848 = vmatpush1.msra.mxu1 %v789_v54  ;;  %v683_v52 = vld [vmem:[%s2558_s7 + $0xe8] sm:$0xff] }
  0x3a   : > { %1552 = vmatpush3.msra.mxu0 %v564_v37  ;;  %849 = vmatprep.subr.mxu1 %v781_v55  ;;  %v746_v37 = vld [vmem:[%s2558_s7 + $0x2e0] sm:$0xff]  ;;  %v675_v54 = vld [vmem:[%s2558_s7 + $0xa8] sm:$0xff]  ;;  %v672_v55 = vld [vmem:[%s2558_s7 + $0x90] sm:$0xff] }
  0x3b   : > { %1553 = vmatprep.subr.mxu0 %v563_v38  ;;  %850 = vmatpush1.msra.mxu1 %v780_v56  ;;  %v674_v56 = vld [vmem:[%s2558_s7 + $0xa0] sm:$0xff] }
  0x3c   : > { %1554 = vmatpush3.msra.mxu0 %v563_v38  ;;  %851 = vmatprep.subr.mxu1 %v772_v57  ;;  %v738_v38 = vld [vmem:[%s2558_s7 + $0x2a0] sm:$0xff]  ;;  %v664_v57 = vld [vmem:[%s2558_s7 + $0x50] sm:$0xff] }
  0x3d   : > { %1555 = vmatprep.subr.mxu0 %v562_v39  ;;  %852 = vmatpush1.msra.mxu1 %v771_v58  ;;  %v666_v58 = vld [vmem:[%s2558_s7 + $0x60] sm:$0xff] }
  0x3e   : > { %1556 = vmatpush3.msra.mxu0 %v562_v39  ;;  %853 = vmatprep.subr.mxu1 %v763_v59  ;;  %v737_v39 = vld [vmem:[%s2558_s7 + $0x298] sm:$0xff]  ;;  %v663_v59 = vld [vmem:[%s2558_s7 + $0x48] sm:$0xff] }
  0x3f   : > { %1557 = vmatprep.subr.mxu0 %v561_v40  ;;  %854 = vmatpush1.msra.mxu1 %v762_v60  ;;  %v665_v60 = vld [vmem:[%s2558_s7 + $0x58] sm:$0xff] }
  0x40   : > { %1558 = vmatpush3.msra.mxu0 %v561_v40  ;;  %855 = vmatprep.subr.mxu1 %v754_v61  ;;  %v729_v40 = vld [vmem:[%s2558_s7 + $0x258] sm:$0xff]  ;;  %v655_v61 = vld [vmem:[%s2558_s7 + $0x8] sm:$0xff] }
  0x41   : > { %1559 = vmatprep.subr.mxu0 %v560_v41  ;;  %856 = vmatpush1.msra.mxu1 %v753_v62  ;;  %v657_v62 = vld [vmem:[%s2558_s7 + $0x18] sm:$0xff] }
  0x42   : > { %1560 = vmatpush3.msra.mxu0 %v560_v41  ;;  %857 = vmatprep.subr.mxu1 %v745_v63  ;;  %v728_v41 = vld [vmem:[%s2558_s7 + $0x250] sm:$0xff]  ;;  %v654_v63 = vld [vmem:[%s2558_s7] sm:$0xff] }
  0x43   : > { %1561 = vmatprep.subr.mxu0 %v559_v42  ;;  %858 = vmatpush1.msra.mxu1 %v744_v0  ;;  %v656_v0 = vld [vmem:[%s2558_s7 + $0x10] sm:$0xff] }
  0x44   : > { %1562 = vmatpush3.msra.mxu0 %v559_v42  ;;  %859 = vmatprep.subr.mxu1 %v736_v1  ;;  %v720_v42 = vld [vmem:[%s2558_s7 + $0x210] sm:$0xff]  ;;  %v794_v1 = vld [vmem:[%s2558_s7 + $0x460] sm:$0xff] }
  0x45   : > { %1563 = vmatprep.subr.mxu0 %v558_v43  ;;  %860 = vmatpush1.msra.mxu1 %v735_v2  ;;  %v796_v2 = vld [vmem:[%s2558_s7 + $0x470] sm:$0xff] }
  0x46   : > { %1564 = vmatpush3.msra.mxu0 %v558_v43  ;;  %861 = vmatprep.subr.mxu1 %v727_v3  ;;  %v719_v43 = vld [vmem:[%s2558_s7 + $0x208] sm:$0xff]  ;;  %v1729_v3 = vmov 0.0  }
  0x47   : > { %1565 = vmatprep.subr.mxu0 %v557_v44  ;;  %862 = vmatpush1.msra.mxu1 %v726_v4 }
  0x48   : > { %1566 = vmatpush3.msra.mxu0 %v557_v44  ;;  %863 = vmatprep.subr.mxu1 %v718_v5  ;;  %v711_v44 = vld [vmem:[%s2558_s7 + $0x1c8] sm:$0xff]  ;;  %v1400_v5 = vld [vmem:[%s2557_s6] ss:$0 sm:$0xff] }
  0x49   : > { %1567 = vmatprep.subr.mxu0 %v556_v45  ;;  %864 = vmatpush1.msra.mxu1 %v717_v6 }
  0x4a   : > { %1568 = vmatpush3.msra.mxu0 %v556_v45  ;;  %865 = vmatprep.subr.mxu1 %v709_v7  ;;  %v710_v45 = vld [vmem:[%s2558_s7 + $0x1c0] sm:$0xff] }
  0x4b   : > { %1569 = vmatprep.subr.mxu0 %v555_v46  ;;  %866 = vmatpush1.msra.mxu1 %v708_v8 }
  0x4c   : > { %1570 = vmatpush3.msra.mxu0 %v555_v46  ;;  %867 = vmatprep.subr.mxu1 %v700_v9  ;;  %v702_v46 = vld [vmem:[%s2558_s7 + $0x180] sm:$0xff] }
  0x4d   : > { %1571 = vmatprep.subr.mxu0 %v554_v47  ;;  %868 = vmatpush1.msra.mxu1 %v699_v10  ;;  %v793_v10 = vld [vmem:[%s2558_s7 + $0x458] sm:$0xff] }
  0x4e   : > { %1572 = vmatpush3.msra.mxu0 %v554_v47  ;;  %869 = vmatprep.subr.mxu1 %v691_v11  ;;  %v701_v47 = vld [vmem:[%s2558_s7 + $0x178] sm:$0xff]  ;;  %v795_v11 = vld [vmem:[%s2558_s7 + $0x468] sm:$0xff] }
  0x4f   : > { %1573 = vmatprep.subr.mxu0 %v553_v48  ;;  %870 = vmatpush1.msra.mxu1 %v690_v12 }
  0x50   : > { %1574 = vmatpush3.msra.mxu0 %v553_v48  ;;  %871 = vmatprep.subr.mxu1 %v682_v13  ;;  %v693_v48 = vld [vmem:[%s2558_s7 + $0x138] sm:$0xff] }
  0x51   : > { %1575 = vmatprep.subr.mxu0 %v552_v49  ;;  %911 = vmatprep.mubr.f32.mxu1 %v1729_v3  ;;  %v785_v13 = vld [vmem:[%s2558_s7 + $0x418] sm:$0xff] }
  0x52   : > { %1576 = vmatpush3.msra.mxu0 %v552_v49  ;;  %v692_v49 = vld [vmem:[%s2558_s7 + $0x130] sm:$0xff] }
  0x53   : > { %1577 = vmatprep.subr.mxu0 %v551_v50 }
  0x54   : > { %1578 = vmatpush3.msra.mxu0 %v551_v50  ;;  %v684_v50 = vld [vmem:[%s2558_s7 + $0xf0] sm:$0xff] }
  0x55   : > { %1579 = vmatprep.subr.mxu0 %v550_v51 }
  0x56   : > { %1580 = vmatpush3.msra.mxu0 %v550_v51  ;;  %v681_v51 = vld [vmem:[%s2558_s7 + $0xd8] sm:$0xff] }
  0x57   : > { %924 = vmatprep.subr.mxu0 %v792_v53  ;;  %872 = vmatpush1.msra.mxu1 %v681_v51  ;;  %v673_v53 = vld [vmem:[%s2558_s7 + $0x98] sm:$0xff]  ;;  %v704_v51 = vld [vmem:[%s2558_s7 + $0x190] sm:$0xff] }
  0x58   : > { %873 = vmatprep.subr.mxu1 %v673_v53  ;;  %v703_v53 = vld [vmem:[%s2558_s7 + $0x188] sm:$0xff] }
  0x59   : > { %874 = vmatpush1.msra.mxu1 %v672_v55  ;;  %v695_v55 = vld [vmem:[%s2558_s7 + $0x148] sm:$0xff] }
  0x5a   : > { %875 = vmatprep.subr.mxu1 %v664_v57  ;;  %v694_v57 = vld [vmem:[%s2558_s7 + $0x140] sm:$0xff] }
  0x5b   : > { %876 = vmatpush1.msra.mxu1 %v663_v59  ;;  %v686_v59 = vld [vmem:[%s2558_s7 + $0x100] sm:$0xff] }
  0x5c   : > { %877 = vmatprep.subr.mxu1 %v655_v61  ;;  %v685_v61 = vld [vmem:[%s2558_s7 + $0xf8] sm:$0xff] }
  0x5d   : > { %878 = vmatpush1.msra.mxu1 %v654_v63  ;;  %v677_v63 = vld [vmem:[%s2558_s7 + $0xb8] sm:$0xff] }
  0x5e   : > { %1001 = vmatprep.subr.mxu1 %v794_v1  ;;  %v676_v1 = vld [vmem:[%s2558_s7 + $0xb0] sm:$0xff] }
  0xf6   : > { %v1513_v14 = vpop.f32.mrf.mxu0 }
  0xf7   : > { %v1548_v15 = vpop.f32.mrf.mxu1 }
  0xf8   : > { %v534_v17 = vadd.f32 %v1548_v15, %v1513_v14  ;;  %v453_v18 = vpop.f32.mrf.mxu0  ;;  %v787_v14 = vld [vmem:[%s2558_s7 + $0x428] sm:$0xff]  ;;  %v784_v15 = vld [vmem:[%s2558_s7 + $0x410] sm:$0xff] }
  0xf9   : > { %v528_v19 = vpop.f32.mrf.mxu1 }
  0xfa   : > { %v545_v20 = vadd.f32 %v1399_v16, %v534_v17  ;;  %v529_v21 = vadd.f32 %v528_v19, %v453_v18  ;;  %v776_v18 = vld [vmem:[%s2558_s7 + $0x3d0] sm:$0xff]  ;;  %v778_v19 = vld [vmem:[%s2558_s7 + $0x3e0] sm:$0xff] }
  0xfc   : > { %v544_v22 = vadd.f32 %v1399_v16, %v529_v21  ;;  %1663 = vtanh.f32 %v545_v20  ;;  %v786_v16 = vld [vmem:[%s2558_s7 + $0x420] sm:$0xff]  ;;  %v775_v20 = vld [vmem:[%s2558_s7 + $0x3c8] sm:$0xff]  ;;  %v777_v21 = vld [vmem:[%s2558_s7 + $0x3d8] sm:$0xff] }
  0xfe   : > { %1665 = vtanh.f32 %v544_v22 }
 0x109   : > { %v1664_v23 = vpop.eup %1663 }
 0x10a   : > { %v549_v26 = vmul.f32 %v1664_v23, %v1937_v34  ;;  %v756_v34 = vld [vmem:[%s2558_s7 + $0x330] sm:$0xff]  ;;  %v767_v23 = vld [vmem:[%s2558_s7 + $0x388] sm:$0xff] }
 0x10b   : > { %v1666_v24 = vpop.eup %1665 }
 0x10c   : > { %v548_v25 = vmul.f32 %v1666_v24, %v1935_v32  ;;  %v765_v32 = vld [vmem:[%s2558_s7 + $0x378] sm:$0xff] }
 0x10d   : > { %v769_v24 = vld [vmem:[%s2558_s7 + $0x398] sm:$0xff] }
 0x10e   : > { %1581 = vmatprep.mubr.f32.mxu0 %v548_v25  ;;  %v766_v25 = vld [vmem:[%s2558_s7 + $0x380] sm:$0xff] }
 0x10f   : > { %1582 = vmatmul.mubr.f32.vlgmr.msra.gmra.mxu0 %v549_v26  ;;  %v768_v26 = vld [vmem:[%s2558_s7 + $0x390] sm:$0xff] }
 0x110   : > { %925 = vmatpush1.msra.mxu0 %v791_v27  ;;  %988 = vmatprep.mubr.f32.mxu0 %v1729_v3  ;;  %v758_v27 = vld [vmem:[%s2558_s7 + $0x340] sm:$0xff] }
 0x111   : > { %926 = vmatprep.subr.mxu0 %v783_v28  ;;  %v760_v28 = vld [vmem:[%s2558_s7 + $0x350] sm:$0xff] }
 0x112   : > { %927 = vmatpush1.msra.mxu0 %v782_v29  ;;  %v757_v29 = vld [vmem:[%s2558_s7 + $0x338] sm:$0xff] }
 0x113   : > { %928 = vmatprep.subr.mxu0 %v774_v30  ;;  %v759_v30 = vld [vmem:[%s2558_s7 + $0x348] sm:$0xff] }
 0x114   : > { %929 = vmatpush1.msra.mxu0 %v773_v31  ;;  %v749_v31 = vld [vmem:[%s2558_s7 + $0x2f8] sm:$0xff] }
 0x115   : > { %930 = vmatprep.subr.mxu0 %v765_v32  ;;  %v751_v32 = vld [vmem:[%s2558_s7 + $0x308] sm:$0xff] }
 0x116   : > { %931 = vmatpush1.msra.mxu0 %v764_v33  ;;  %v748_v33 = vld [vmem:[%s2558_s7 + $0x2f0] sm:$0xff] }
 0x117   : > { %932 = vmatprep.subr.mxu0 %v756_v34  ;;  %v750_v34 = vld [vmem:[%s2558_s7 + $0x300] sm:$0xff] }
 0x118   : > { %933 = vmatpush1.msra.mxu0 %v755_v35  ;;  %v740_v35 = vld [vmem:[%s2558_s7 + $0x2b0] sm:$0xff] }
 0x119   : > { %934 = vmatprep.subr.mxu0 %v747_v36  ;;  %v742_v36 = vld [vmem:[%s2558_s7 + $0x2c0] sm:$0xff] }
 0x11a   : > { %935 = vmatpush1.msra.mxu0 %v746_v37  ;;  %v739_v37 = vld [vmem:[%s2558_s7 + $0x2a8] sm:$0xff] }
 0x11b   : > { %936 = vmatprep.subr.mxu0 %v738_v38  ;;  %v741_v38 = vld [vmem:[%s2558_s7 + $0x2b8] sm:$0xff] }
 0x11c   : > { %937 = vmatpush1.msra.mxu0 %v737_v39  ;;  %v731_v39 = vld [vmem:[%s2558_s7 + $0x268] sm:$0xff] }
 0x11d   : > { %938 = vmatprep.subr.mxu0 %v729_v40  ;;  %v733_v40 = vld [vmem:[%s2558_s7 + $0x278] sm:$0xff] }
 0x11e   : > { %939 = vmatpush1.msra.mxu0 %v728_v41  ;;  %v730_v41 = vld [vmem:[%s2558_s7 + $0x260] sm:$0xff] }
 0x11f   : > { %940 = vmatprep.subr.mxu0 %v720_v42  ;;  %v732_v42 = vld [vmem:[%s2558_s7 + $0x270] sm:$0xff] }
 0x120   : > { %941 = vmatpush1.msra.mxu0 %v719_v43  ;;  %v722_v43 = vld [vmem:[%s2558_s7 + $0x220] sm:$0xff] }
 0x121   : > { %942 = vmatprep.subr.mxu0 %v711_v44  ;;  %v724_v44 = vld [vmem:[%s2558_s7 + $0x230] sm:$0xff] }
 0x122   : > { %943 = vmatpush1.msra.mxu0 %v710_v45  ;;  %v721_v45 = vld [vmem:[%s2558_s7 + $0x218] sm:$0xff] }
 0x123   : > { %944 = vmatprep.subr.mxu0 %v702_v46  ;;  %v723_v46 = vld [vmem:[%s2558_s7 + $0x228] sm:$0xff] }
 0x124   : > { %945 = vmatpush1.msra.mxu0 %v701_v47  ;;  %v713_v47 = vld [vmem:[%s2558_s7 + $0x1d8] sm:$0xff] }
 0x125   : > { %946 = vmatprep.subr.mxu0 %v693_v48  ;;  %v715_v48 = vld [vmem:[%s2558_s7 + $0x1e8] sm:$0xff] }
 0x126   : > { %947 = vmatpush1.msra.mxu0 %v692_v49  ;;  %v712_v49 = vld [vmem:[%s2558_s7 + $0x1d0] sm:$0xff] }
 0x127   : > { %948 = vmatprep.subr.mxu0 %v684_v50  ;;  %v714_v50 = vld [vmem:[%s2558_s7 + $0x1e0] sm:$0xff] }
 0x128   : > { %949 = vmatpush1.msra.mxu0 %v683_v52  ;;  %v706_v52 = vld [vmem:[%s2558_s7 + $0x1a0] sm:$0xff] }
 0x129   : > { %950 = vmatprep.subr.mxu0 %v675_v54  ;;  %v705_v54 = vld [vmem:[%s2558_s7 + $0x198] sm:$0xff] }
 0x12a   : > { %951 = vmatpush1.msra.mxu0 %v674_v56  ;;  %v697_v56 = vld [vmem:[%s2558_s7 + $0x158] sm:$0xff] }
 0x12b   : > { %952 = vmatprep.subr.mxu0 %v666_v58  ;;  %v696_v58 = vld [vmem:[%s2558_s7 + $0x150] sm:$0xff] }
 0x12c   : > { %953 = vmatpush1.msra.mxu0 %v665_v60  ;;  %v688_v60 = vld [vmem:[%s2558_s7 + $0x110] sm:$0xff] }
 0x12d   : > { %954 = vmatprep.subr.mxu0 %v657_v62  ;;  %v687_v62 = vld [vmem:[%s2558_s7 + $0x108] sm:$0xff] }
 0x12e   : > { %955 = vmatpush1.msra.mxu0 %v656_v0  ;;  %v679_v0 = vld [vmem:[%s2558_s7 + $0xc8] sm:$0xff] }
 0x12f   : > { %1078 = vmatprep.subr.mxu0 %v796_v2  ;;  %v678_v2 = vld [vmem:[%s2558_s7 + $0xc0] sm:$0xff] }
 0x1cf   : > { %v1583_v4 = vpop.f32.mrf.mxu0 }
 0x1d0   : > { %v645_v8 = vadd.f32 %v1583_v4, %v1400_v5  ;;  %v668_v4 = vld [vmem:[%s2558_s7 + $0x70] sm:$0xff] }
 0x1d1   : > { %v639_v6 = vpop.f32.mrf.mxu0 }
 0x1d2   : > { %v640_v7 = vadd.f32 %v1400_v5, %v639_v6  ;;  %v651_v17 = vmul.f32 0.25, %v645_v8  ;;  %vm649_vm1 = vcmp.ge.f32.partialorder %v645_v8, 0.0  ;;  %v670_v5 = vld [vmem:[%s2558_s7 + $0x80] sm:$0xff]  ;;  %v667_v6 = vld [vmem:[%s2558_s7 + $0x68] sm:$0xff] }
 0x1d4   : > { %vm648_vm0 = vcmp.ge.f32.partialorder %v640_v7, 0.0  ;;  %v650_v9 = vmul.f32 0.25, %v640_v7  ;;  %v2233_v22 = vsel %vm649_vm1, %v645_v8, %v651_v17  ;;  %v659_v8 = vld [vmem:[%s2558_s7 + $0x28] sm:$0xff]  ;;  %v752_v17 = vld [vmem:[%s2558_s7 + $0x310] sm:$0xff] }
 0x1d6   : > { %v2203_v12 = vsel %vm648_vm0, %v640_v7, %v650_v9  ;;  %v669_v7 = vld [vmem:[%s2558_s7 + $0x78] sm:$0xff] }
 0x1d7   : > { %912 = vmatmul.mubr.f32.vlgmr.msra.gmra.mxu1 %v2203_v12  ;;  %989 = vmatmul.mubr.f32.vlgmr.msra.gmra.mxu0 %v2203_v12  ;;  %v661_v9 = vld [vmem:[%s2558_s7 + $0x38] sm:$0xff] }
 0x1d8   : > { %1002 = vmatpush1.msra.mxu1 %v793_v10  ;;  %1079 = vmatpush1.msra.mxu0 %v795_v11  ;;  %v658_v10 = vld [vmem:[%s2558_s7 + $0x20] sm:$0xff]  ;;  %v660_v11 = vld [vmem:[%s2558_s7 + $0x30] sm:$0xff] }
 0x1d9   : > { %1003 = vmatprep.subr.mxu1 %v785_v13  ;;  %1080 = vmatprep.subr.mxu0 %v787_v14  ;;  %v797_v13 = vld [vmem:[%s2558_s7 + $0x478] sm:$0xff]  ;;  %v788_v14 = vld [vmem:[%s2558_s7 + $0x430] sm:$0xff] }
 0x1da   : > { %1004 = vmatpush1.msra.mxu1 %v784_v15  ;;  %1081 = vmatpush1.msra.mxu0 %v786_v16  ;;  %v779_v15 = vld [vmem:[%s2558_s7 + $0x3e8] sm:$0xff]  ;;  %v770_v16 = vld [vmem:[%s2558_s7 + $0x3a0] sm:$0xff] }
 0x1db   : > { %917 = vmatprep.mubr.f32.mxu1 %v1729_v3  ;;  %994 = vmatprep.mubr.f32.mxu0 %v1729_v3 }
 0x1dc   : > { %1005 = vmatprep.subr.mxu1 %v776_v18  ;;  %1082 = vmatprep.subr.mxu0 %v778_v19  ;;  %v743_v18 = vld [vmem:[%s2558_s7 + $0x2c8] sm:$0xff]  ;;  %v725_v19 = vld [vmem:[%s2558_s7 + $0x238] sm:$0xff] }
 0x1dd   : > { %918 = vmatmul.mubr.f32.gmra.mxu1 %v2233_v22  ;;  %995 = vmatmul.mubr.f32.gmra.mxu0 %v2233_v22 }
 0x1de   : > { %1006 = vmatpush1.msra.mxu1 %v775_v20  ;;  %1083 = vmatpush1.msra.mxu0 %v777_v21  ;;  %v716_v20 = vld [vmem:[%s2558_s7 + $0x1f0] sm:$0xff]  ;;  %v707_v21 = vld [vmem:[%s2558_s7 + $0x1a8] sm:$0xff] }
 0x1df   : > { %1007 = vmatprep.subr.mxu1 %v767_v23  ;;  %1084 = vmatprep.subr.mxu0 %v769_v24  ;;  %v698_v23 = vld [vmem:[%s2558_s7 + $0x160] sm:$0xff]  ;;  %v689_v24 = vld [vmem:[%s2558_s7 + $0x118] sm:$0xff] }
 0x1e0   : > { %1008 = vmatpush1.msra.mxu1 %v766_v25  ;;  %1085 = vmatpush1.msra.mxu0 %v768_v26  ;;  %v680_v25 = vld [vmem:[%s2558_s7 + $0xd0] sm:$0xff]  ;;  %v671_v26 = vld [vmem:[%s2558_s7 + $0x88] sm:$0xff] }
 0x1e1   : > { %1009 = vmatprep.subr.mxu1 %v758_v27  ;;  %1086 = vmatprep.subr.mxu0 %v760_v28  ;;  %v662_v27 = vld [vmem:[%s2558_s7 + $0x40] sm:$0xff]  ;;  %v802_v28 = vlaneseq }
 0x1e2   : > { %1010 = vmatpush1.msra.mxu1 %v757_v29  ;;  %1087 = vmatpush1.msra.mxu0 %v759_v30 }
 0x1e3   : > { %1011 = vmatprep.subr.mxu1 %v749_v31  ;;  %1088 = vmatprep.subr.mxu0 %v751_v32  ;;  %v2451_v29 = vshrl.u32 %v802_v28, 7  ;;  %v2458_v32 = vld [vmem:[%s2559_s8] sm:$0xff] }
 0x1e4   : > { %1012 = vmatpush1.msra.mxu1 %v748_v33  ;;  %1089 = vmatpush1.msra.mxu0 %v750_v34 }
 0x1e5   : > { %1013 = vmatprep.subr.mxu1 %v740_v35  ;;  %1090 = vmatprep.subr.mxu0 %v742_v36  ;;  %v804_v30 = vsub.s32 0, %v2451_v29  ;;  %v812_v31 = vsub.s32 2, %v2451_v29  ;;  %v808_v33 = vsub.s32 1, %v2451_v29  ;;  %v816_v34 = vsub.s32 3, %v2451_v29 }
 0x1e6   : > { %1014 = vmatpush1.msra.mxu1 %v739_v37  ;;  %1091 = vmatpush1.msra.mxu0 %v741_v38 }
 0x1e7   : > { %1015 = vmatprep.subr.mxu1 %v731_v39  ;;  %1092 = vmatprep.subr.mxu0 %v733_v40  ;;  %v805_v35 = vrot.slane %v2458_v32, %v804_v30  ;;  %v809_v38 = vrot.slane %v2458_v32, %v808_v33  ;;  %v817_v39 = vrot.slane %v2458_v32, %v816_v34 }
 0x1e8   : > { %1016 = vmatpush1.msra.mxu1 %v730_v41  ;;  %1093 = vmatpush1.msra.mxu0 %v732_v42 }
 0x1e9   : > { %1017 = vmatprep.subr.mxu1 %v722_v43  ;;  %1094 = vmatprep.subr.mxu0 %v724_v44 }
 0x1ea   : > { %1018 = vmatpush1.msra.mxu1 %v721_v45  ;;  %1095 = vmatpush1.msra.mxu0 %v723_v46 }
 0x1eb   : > { %1019 = vmatprep.subr.mxu1 %v713_v47  ;;  %1096 = vmatprep.subr.mxu0 %v715_v48 }
 0x1ec   : > { %1020 = vmatpush1.msra.mxu1 %v712_v49  ;;  %1097 = vmatpush1.msra.mxu0 %v714_v50 }
 0x1ed   : > { %1021 = vmatprep.subr.mxu1 %v704_v51  ;;  %1098 = vmatprep.subr.mxu0 %v706_v52 }
 0x1ee   : > { %1022 = vmatpush1.msra.mxu1 %v703_v53  ;;  %1099 = vmatpush1.msra.mxu0 %v705_v54 }
 0x1ef   : > { %1023 = vmatprep.subr.mxu1 %v695_v55  ;;  %1100 = vmatprep.subr.mxu0 %v697_v56 }
 0x1f0   : > { %1024 = vmatpush1.msra.mxu1 %v694_v57  ;;  %1101 = vmatpush1.msra.mxu0 %v696_v58 }
 0x1f1   : > { %1025 = vmatprep.subr.mxu1 %v686_v59  ;;  %1102 = vmatprep.subr.mxu0 %v688_v60 }
 0x1f2   : > { %1026 = vmatpush1.msra.mxu1 %v685_v61  ;;  %1103 = vmatpush1.msra.mxu0 %v687_v62 }
 0x1f3   : > { %1027 = vmatprep.subr.mxu1 %v677_v63  ;;  %1104 = vmatprep.subr.mxu0 %v679_v0 }
 0x1f4   : > { %1028 = vmatpush1.msra.mxu1 %v676_v1  ;;  %1105 = vmatpush1.msra.mxu0 %v678_v2 }
 0x1f5   : > { %1029 = vmatprep.subr.mxu1 %v668_v4  ;;  %1106 = vmatprep.subr.mxu0 %v670_v5 }
 0x1f6   : > { %1030 = vmatpush1.msra.mxu1 %v667_v6  ;;  %1107 = vmatpush1.msra.mxu0 %v669_v7  ;;  %v820_v7 = vsub.s32 4, %v2451_v29 }
 0x1f7   : > { %1031 = vmatprep.subr.mxu1 %v659_v8  ;;  %1108 = vmatprep.subr.mxu0 %v661_v9  ;;  %v828_v8 = vsub.s32 6, %v2451_v29  ;;  %v824_v9 = vsub.s32 5, %v2451_v29 }
 0x1f8   : > { %1032 = vmatpush1.msra.mxu1 %v658_v10  ;;  %1065 = vmatprep.mubr.f32.mxu1 %v1729_v3  ;;  %v832_v10 = vsub.s32 7, %v2451_v29 }
 0x1f9   : > { %1109 = vmatpush1.msra.mxu0 %v660_v11  ;;  %1142 = vmatprep.mubr.f32.mxu0 %v1729_v3  ;;  %v821_v11 = vrot.slane %v2458_v32, %v820_v7 }
 0x1fa   : > { %1066 = vmatmul.mubr.f32.vlgmr.msra.gmra.mxu1 %v2203_v12  ;;  %1143 = vmatmul.mubr.f32.vlgmr.msra.gmra.mxu0 %v2203_v12 }
 0x1fb   : > { %1584 = vmatprep.subr.mxu1 %v797_v13  ;;  %1071 = vmatprep.mubr.f32.mxu1 %v1729_v3 }
 0x1fc   : > { %1585 = vmatpush3.msra.mxu1 %v797_v13  ;;  %1148 = vmatprep.mubr.f32.mxu0 %v1729_v3  ;;  %v761_v3 = vld [vmem:[%s2558_s7 + $0x358] sm:$0xff]  ;;  %v829_v13 = vrot.slane %v2458_v32, %v828_v8 }
 0x1fd   : > { %1586 = vmatprep.subr.mxu1 %v788_v14 }
 0x1fe   : > { %1587 = vmatpush3.msra.mxu1 %v788_v14  ;;  %1149 = vmatmul.mubr.f32.gmra.mxu0 %v2233_v22 }
 0x1ff   : > { %1072 = vmatmul.mubr.f32.gmra.mxu1 %v2233_v22  ;;  %1588 = vmatprep.subr.mxu1 %v779_v15 }
 0x200   : > { %1589 = vmatpush3.msra.mxu1 %v779_v15  ;;  %1616 = vmatprep.mubr.f32.mxu1 %v2203_v12  ;;  %v734_v12 = vld [vmem:[%s2558_s7 + $0x280] sm:$0xff] }
 0x201   : > { %1590 = vmatprep.subr.mxu1 %v770_v16 }
 0x202   : > { %1591 = vmatpush3.msra.mxu1 %v770_v16  ;;  %v825_v16 = vrot.slane %v2458_v32, %v824_v9 }
 0x203   : > { %1592 = vmatprep.subr.mxu1 %v761_v3 }
 0x204   : > { %1593 = vmatpush3.msra.mxu1 %v761_v3  ;;  %v833_v3 = vrot.slane %v2458_v32, %v832_v10 }
 0x205   : > { %1594 = vmatprep.subr.mxu1 %v752_v17 }
 0x206   : > { %1595 = vmatpush3.msra.mxu1 %v752_v17 }
 0x207   : > { %1596 = vmatprep.subr.mxu1 %v743_v18 }
 0x208   : > { %1597 = vmatpush3.msra.mxu1 %v743_v18 }
 0x209   : > { %1598 = vmatprep.subr.mxu1 %v734_v12 }
 0x20a   : > { %1599 = vmatpush3.msra.mxu1 %v734_v12 }
 0x20b   : > { %1600 = vmatprep.subr.mxu1 %v725_v19 }
 0x20c   : > { %1601 = vmatpush3.msra.mxu1 %v725_v19 }
 0x20d   : > { %1602 = vmatprep.subr.mxu1 %v716_v20 }
 0x20e   : > { %1603 = vmatpush3.msra.mxu1 %v716_v20 }
 0x20f   : > { %1604 = vmatprep.subr.mxu1 %v707_v21 }
 0x210   : > { %1605 = vmatpush3.msra.mxu1 %v707_v21 }
 0x211   : > { %1606 = vmatprep.subr.mxu1 %v698_v23 }
 0x212   : > { %1607 = vmatpush3.msra.mxu1 %v698_v23 }
 0x213   : > { %1608 = vmatprep.subr.mxu1 %v689_v24 }
 0x214   : > { %1609 = vmatpush3.msra.mxu1 %v689_v24 }
 0x215   : > { %1610 = vmatprep.subr.mxu1 %v680_v25 }
 0x216   : > { %1611 = vmatpush3.msra.mxu1 %v680_v25 }
 0x217   : > { %1612 = vmatprep.subr.mxu1 %v671_v26 }
 0x218   : > { %1613 = vmatpush3.msra.mxu1 %v671_v26 }
 0x219   : > { %1614 = vmatprep.subr.mxu1 %v662_v27 }
 0x21a   : > { %1615 = vmatpush3.msra.mxu1 %v662_v27 }
 0x21b   : > { %1617 = vmatmul.mubr.f32.vlgmr.msra.gmra.mxu1 %v2233_v22  ;;  %v813_v22 = vrot.slane %v2458_v32, %v812_v31 }
 0x297   : > { %v913_v36 = vpop.f32.mrf.mxu1  ;;  %v990_v37 = vpop.f32.mrf.mxu0 }
 0x298   : > { %v914_v40 = vadd.f32 %v913_v36, %v805_v35  ;;  %v991_v41 = vadd.f32 %v990_v37, %v813_v22 }
 0x299   : > { %v915_v42 = vpop.f32.mrf.mxu1  ;;  %v992_v43 = vpop.f32.mrf.mxu0 }
 0x29a   : > { %vm1230_vm2 = vcmp.ge.f32.partialorder %v914_v40, 0.0  ;;  %v1248_v44 = vmul.f32 0.25, %v914_v40  ;;  %vm1232_vm3 = vcmp.ge.f32.partialorder %v991_v41, 0.0  ;;  %v1250_v45 = vmul.f32 0.25, %v991_v41 }
 0x29b   : > { %v916_v46 = vadd.f32 %v915_v42, %v809_v38  ;;  %v993_v47 = vadd.f32 %v992_v43, %v817_v39 }
 0x29c   : > { %v1266_v48 = vsel %vm1230_vm2, %v914_v40, %v1248_v44  ;;  %v1268_v49 = vsel %vm1232_vm3, %v991_v41, %v1250_v45  ;;  %vm1292_vm3 = vcmask 195584  }
 0x29d   : > { %1284 = vst [vmem:[%s2469_s29] sm:$0xff] %v1266_v48  ;;  %1286 = vst [vmem:[%s2469_s29 + $0x10] sm:$0xff] %v1268_v49  ;;  %vm1231_vm4 = vcmp.ge.f32.partialorder %v916_v46, 0.0  ;;  %v1249_v50 = vmul.f32 0.25, %v916_v46  ;;  %vm1233_vm5 = vcmp.ge.f32.partialorder %v993_v47, 0.0  ;;  %v1251_v51 = vmul.f32 0.25, %v993_v47  ;;  %v919_v52 = vpop.f32.mrf.mxu1  ;;  %v996_v53 = vpop.f32.mrf.mxu0 }
 0x29e   : > { %v920_v54 = vadd.f32 %v919_v52, %v805_v35  ;;  %v997_v55 = vadd.f32 %v996_v53, %v813_v22 }
 0x29f   : > { %v1267_v56 = vsel %vm1231_vm4, %v916_v46, %v1249_v50  ;;  %v1269_v57 = vsel %vm1233_vm5, %v993_v47, %v1251_v51  ;;  %v921_v58 = vpop.f32.mrf.mxu1  ;;  %v998_v59 = vpop.f32.mrf.mxu0  ;;  %v1401_v46 = vld [vmem:[%s2559_s8 + $0x8] ss:$0 sm:$0xff] }
 0x2a0   : > { %1285 = vst [vmem:[%s2469_s29 + $0x8] sm:$0xff] %v1267_v56  ;;  %1287 = vst [vmem:[%s2469_s29 + $0x18] sm:$0xff] %v1269_v57  ;;  %vm1239_vm6 = vcmp.ge.f32.partialorder %v920_v54, 0.0  ;;  %v1257_v60 = vmul.f32 0.25, %v920_v54  ;;  %vm1241_vm7 = vcmp.ge.f32.partialorder %v997_v55, 0.0  ;;  %v1259_v61 = vmul.f32 0.25, %v997_v55 }
 0x2a1   : > { %v922_v62 = vadd.f32 %v921_v58, %v809_v38  ;;  %v999_v63 = vadd.f32 %v998_v59, %v817_v39 }
 0x2a2   : > { %v1275_v0 = vsel %vm1239_vm6, %v920_v54, %v1257_v60  ;;  %v1277_v1 = vsel %vm1241_vm7, %v997_v55, %v1259_v61 }
 0x2a3   : > { %1294 = vst [vmem:[%s2469_s29 + $0x48] sm:$0xff] %v1275_v0  ;;  %1296 = vst [vmem:[%s2469_s29 + $0x58] sm:$0xff] %v1277_v1  ;;  %vm1240_vm8 = vcmp.ge.f32.partialorder %v922_v62, 0.0  ;;  %v1258_v2 = vmul.f32 0.25, %v922_v62  ;;  %vm1242_vm9 = vcmp.ge.f32.partialorder %v999_v63, 0.0  ;;  %v1260_v4 = vmul.f32 0.25, %v999_v63 }
 0x2a5   : > { %v1276_v5 = vsel %vm1240_vm8, %v922_v62, %v1258_v2  ;;  %v1278_v6 = vsel %vm1242_vm9, %v999_v63, %v1260_v4 }
 0x2a6   : > { %1295 = vst [vmem:[%s2469_s29 + $0x50] sm:$0xff] %v1276_v5  ;;  %1297 = vst [vmem:[%s2469_s29 + $0x60] sm:$0xff] %v1278_v6 }
 0x2ba   : > { %v1067_v14 = vpop.f32.mrf.mxu1  ;;  %v1144_v15 = vpop.f32.mrf.mxu0 }
 0x2bb   : > { %v1068_v17 = vadd.f32 %v1067_v14, %v821_v11  ;;  %v1145_v18 = vadd.f32 %v1144_v15, %v829_v13 }
 0x2bc   : > { %v1069_v12 = vpop.f32.mrf.mxu1  ;;  %v1146_v19 = vpop.f32.mrf.mxu0 }
 0x2bd   : > { %vm1234_vm10 = vcmp.ge.f32.partialorder %v1068_v17, 0.0  ;;  %v1252_v20 = vmul.f32 0.25, %v1068_v17  ;;  %vm1236_vm11 = vcmp.ge.f32.partialorder %v1145_v18, 0.0  ;;  %v1254_v21 = vmul.f32 0.25, %v1145_v18 }
 0x2be   : > { %v1070_v23 = vadd.f32 %v1069_v12, %v825_v16  ;;  %v1147_v24 = vadd.f32 %v1146_v19, %v833_v3  ;;  %v1150_v25 = vpop.f32.mrf.mxu0 }
 0x2bf   : > { %v1270_v26 = vsel %vm1234_vm10, %v1068_v17, %v1252_v20  ;;  %v1272_v27 = vsel %vm1236_vm11, %v1145_v18, %v1254_v21  ;;  %v1073_v28 = vpop.f32.mrf.mxu1  ;;  %v1151_v29 = vadd.f32 %v1150_v25, %v829_v13 }
 0x2c0   : > { %1288 = vst [vmem:[%s2469_s29 + $0x20] sm:$0xff] %v1270_v26  ;;  %1290 = vst [vmem:[%s2469_s29 + $0x30] sm:$0xff] %v1272_v27  ;;  %vm1235_vm12 = vcmp.ge.f32.partialorder %v1070_v23, 0.0  ;;  %v1253_v30 = vmul.f32 0.25, %v1070_v23  ;;  %vm1237_vm13 = vcmp.ge.f32.partialorder %v1147_v24, 0.0  ;;  %v1255_v31 = vmul.f32 0.25, %v1147_v24  ;;  %v1152_v32 = vpop.f32.mrf.mxu0 }
 0x2c1   : > { %v1074_v33 = vadd.f32 %v1073_v28, %v821_v11  ;;  %vm1245_vm14 = vcmp.ge.f32.partialorder %v1151_v29, 0.0  ;;  %v1263_v34 = vmul.f32 0.25, %v1151_v29  ;;  %v1075_v35 = vpop.f32.mrf.mxu1  ;;  %v1153_v22 = vadd.f32 %v1152_v32, %v833_v3 }
 0x2c2   : > { %v1271_v36 = vsel %vm1235_vm12, %v1070_v23, %v1253_v30  ;;  %v1273_v37 = vsel %vm1237_vm13, %v1147_v24, %v1255_v31  ;;  %v1076_v38 = vadd.f32 %v1075_v35, %v825_v16 }
 0x2c3   : > { %1289 = vst [vmem:[%s2469_s29 + $0x28] sm:$0xff] %v1271_v36  ;;  %1291 = vst [vmem:[%s2469_s29 + $0x38] sm:$0xff] %v1273_v37  ;;  %vm1243_vm15 = vcmp.ge.f32.partialorder %v1074_v33, 0.0  ;;  %v1261_v39 = vmul.f32 0.25, %v1074_v33  ;;  %v1281_v40 = vsel %vm1245_vm14, %v1151_v29, %v1263_v34  ;;  %vm1246_vm0 = vcmp.ge.f32.partialorder %v1153_v22, 0.0 }
 0x2c4   : > { %1300 = vst [vmem:[%s2469_s29 + $0x78] sm:$0xff] %v1281_v40  ;;  %vm1244_vm1 = vcmp.ge.f32.partialorder %v1076_v38, 0.0  ;;  %v1262_v41 = vmul.f32 0.25, %v1076_v38  ;;  %v1264_v42 = vmul.f32 0.25, %v1153_v22 }
 0x2c5   : > { %v1279_v43 = vsel %vm1243_vm15, %v1074_v33, %v1261_v39 }
 0x2c6   : > { %1298 = vst [vmem:[%s2469_s29 + $0x68] sm:$0xff] %v1279_v43  ;;  %v1280_v44 = vsel %vm1244_vm1, %v1076_v38, %v1262_v41  ;;  %v1282_v45 = vsel %vm1246_vm0, %v1153_v22, %v1264_v42 }
 0x2c7   : > { %1299 = vst [vmem:[%s2469_s29 + $0x70] sm:$0xff] %v1280_v44  ;;  %1301 = vst [vmem:[%s2469_s29 + $0x80] sm:$0xff] %v1282_v45 }
 0x2db   : > { %v1618_v47 = vpop.f32.mrf.mxu1 }
 0x2dc   : > { %v1227_v48 = vadd.f32 %v1618_v47, %v1401_v46 }
 0x2dd   : > { %v1221_v49 = vpop.f32.mrf.mxu1 }
 0x2de   : > { %vm1247_vm2 = vcmp.ge.f32.partialorder %v1227_v48, 0.0  ;;  %v1265_v50 = vmul.f32 0.25, %v1227_v48  ;;  %v1222_v51 = vadd.f32 %v1401_v46, %v1221_v49 }
 0x2e0   : > { %v1283_v52 = vsel %vm1247_vm2, %v1227_v48, %v1265_v50  ;;  %vm1238_vm4 = vcmp.ge.f32.partialorder %v1222_v51, 0.0  ;;  %v1256_v53 = vmul.f32 0.25, %v1222_v51 }
 0x2e1   : > { %1302 = vst.msk [vmem:[%s2469_s29 + $0x88] sm:$0xff] %vm1292_vm3, %v1283_v52 }
 0x2e2   : > { %v1274_v54 = vsel %vm1238_vm4, %v1222_v51, %v1256_v53 }
 0x2e3   : > { %1293 = vst.msk [vmem:[%s2469_s29 + $0x40] sm:$0xff] %vm1292_vm3, %v1274_v54 }
 0x2e4   : > { %1680 = shalt.err (!%p1677_p3)
}
 0x2e5   : > { %s1681_s26 = scalar_lea.hbm %s2503_s16, 2304  ;;  %s1685_s24 = scalar_lea.hbm %s2560_s9, 4608 }
 0x2e6   : > { %p1682_p4 = scmp.ne.s32.totalorder %s2503_s16, %s1681_s26  ;;  %p1686_p9 = scmp.lt.s32.totalorder %s2503_s16, %s2560_s9 }
 0x2e7   : > { %p1687_p10 = scmp.lt.s32.totalorder %s1685_s24, %s1681_s26 }
 0x2e8   : > { %p1683_p7 = pnand %p1682_p4, %p1821_p5 }
 0x2e9   : > { %p1688_p11 = por %p1687_p10, %p1686_p9 }
 0x2ea   : > { %p1684_p8 = pneg %p1683_p7 }
 0x2ec   : > { %p1689_p12 = pnand %p1688_p11, %p1684_p8 }
 0x2ee   : > { %1692 = shalt.err (!%p1689_p12)
}
 0x2ef   : > { %s1731_s14 = smov 1152   ;;  %s1732_s17 = smov 72  }
 0x2f0   : > { %1621 = dma.vmem_to_hbm [thread:$0]  (%p1821_p5), %s2506_s27, 2304, %s2503_s16, %s2511_s13, %s1731_s14, %s1731_s14, %s1732_s17  }
 0x2f1 PF: > { %p1627_p13 = scmp.ge.s32.totalorder %s1727_s12, 2  ;;  %s1332_s21 = sand.u32 1, %s1715_s30  }
 0x2f2   : > { %s1333_s18 = scalar_lea.sflag [#allocation3], %s1332_s21 }
 0x2f3   : > { %p1624_p0 = pnand %p1627_p13, %p1825_p6 }
 0x2f5   : > { %p1625_p1 = pneg %p1624_p0 }
 0x2f7   : > { %1710 = dma.done.wait (%p1625_p1), %s1333_s18, 2304  }
 0x2f8   : > { %1712 = vsyncadd (%p1625_p1), %s1333_s18, 4294964992  ;;  %s2564_s22 = sld [smem:[#allocation5_spill]]  ;;  %p19_p2 = scmp.ge.s32.totalorder %s1808_s15, 4  }
 0x2f9   : > { %s2565_s30 = smov %s1719_s10  ;;  %s2566_s10 = smov %s1723_s11 }
 0x2fa   : > { %s2568_s12 = smov %s1808_s15  ;;  %21 = sbr.rel (!%p19_p2) target bundleno = 3 (0x3), region = 94 }
 0x2fe   : > { %s2567_s11 = smov %s2564_s22 }
 0x2ff   :  { %1338 = vsyncpa [#allocation3], 1 }
 0x300   :  { %1340 = vsyncpa [#allocation3 + $0x1], 1 }

</bundles_post_ra>
